<compile_context>
chip_gen: v5e
topology: v5e:2x2
jax: 0.10.0
libtpu: 0.0.40
codegen_flags: <defaults>
</compile_context>

<pallas_src>
import functools

import jax
import jax.numpy as jnp
import numpy as np
from jax.experimental import pallas as pl
from jax.experimental.pallas import tpu as pltpu

EMBED_SIZE = 320
HEADS = 8
HEAD_DIM = EMBED_SIZE // HEADS       # 40
QUERY_DIM = 320                      # must equal EMBED_SIZE for fused_fwd reshape
KV_DIM = 768


def _cross_attn_kernel(q_ref, qk_ref, vout_ref, seg_ref, bias_ref, o_ref, *,
                       scale, approx_recip):
    """Grid = (row blocks,). One step does the whole head-folded attention.

    q_ref:    (Tm, E)        flattened query rows (compute dtype)
    qk_ref:   (E, H*Lk)      fused Wq@Kproj^T, heads concatenated on lanes
    vout_ref: (H*Lk, E)      fused Vproj@Wout, heads stacked on the K axis
    seg_ref:  (H*Lk, H*Lk)   block-diagonal ones (same-head indicator)
    bias_ref: (1, E)         fc_out bias (f32)
    o_ref:    (Tm, E)        output rows (f32)
    """
    q = q_ref[...]
    qk = qk_ref[...]
    vout = vout_ref[...]
    seg = seg_ref[...]

    # energy for all heads at once: (Tm, H*Lk), lane dim = H*Lk (lane-dense-ish)
    e = jnp.dot(q, qk, preferred_element_type=jnp.float32) * scale

    # Per-row global max is constant within every head group -> exact softmax
    # shift, and keeps every exponent <= 0. Avoids any per-head reshape.
    m = jnp.max(e, axis=-1, keepdims=True)
    p = jnp.exp(e - m)

    # Segmented (per-head) sum, already broadcast back across each head's Lk
    # lanes, via a tiny block-diagonal ones matmul (MXU, co-issues with VPU).
    denom = jnp.dot(p.astype(seg.dtype), seg, preferred_element_type=jnp.float32)
    if approx_recip:
        attn = p * pl.reciprocal(denom, approx=True)   # EUP slot, ~free
    else:
        attn = p / denom

    # Second matmul contracts over H*Lk -> implicit sum over heads.
    out = jnp.dot(attn.astype(vout.dtype), vout, preferred_element_type=jnp.float32)
    o_ref[...] = (out + bias_ref[...]).astype(o_ref.dtype)


def fused_cross_attention(queries, qk, vout, bias, *,
                          compute_dtype=jnp.bfloat16, row_block=None):
    """queries: (N, Lq, E), qk: (H, E, Lk), vout: (H, Lk, E), bias: (E,)"""
    N, Lq, E = queries.shape
    H, _, Lk = qk.shape
    HLk = H * Lk
    rows = N * Lq
    head_dim = E // H

    # ---- head folding + batch flattening (layout plumbing, plain JAX) ----
    q2d = queries.reshape(rows, E).astype(compute_dtype)
    # QK_all[e, h*Lk + k] = qk[h, e, k]
    qk_all = jnp.transpose(qk, (1, 0, 2)).reshape(E, HLk).astype(compute_dtype)
    # Vout_all[h*Lk + k, :] = vout[h, k, :]
    vout_all = vout.reshape(HLk, E).astype(compute_dtype)
    bias2d = bias.reshape(1, E).astype(jnp.float32)
    seg_id = np.arange(HLk) // Lk
    seg = jnp.asarray(seg_id[:, None] == seg_id[None, :], dtype=compute_dtype)

    # ---- row tiling: 2-way split (v7x dual TC), capped for VMEM (v7x 64 MiB) ----
    if row_block is None:
        half = -(-rows // 2)
        row_block = min(512, max(8, 8 * (-(-half // 8))))
    n_blocks = -(-rows // row_block)
    rows_padded = n_blocks * row_block
    if rows_padded != rows:
        q2d = jnp.pad(q2d, ((0, rows_padded - rows), (0, 0)))

    kernel = functools.partial(
        _cross_attn_kernel,
        scale=float(1.0 / (head_dim ** 0.5)),
        approx_recip=(jnp.dtype(compute_dtype) == jnp.dtype(jnp.bfloat16)))

    out2d = pl.pallas_call(
        kernel,
        out_shape=jax.ShapeDtypeStruct((rows_padded, E), jnp.float32),
        grid_spec=pltpu.PrefetchScalarGridSpec(
            num_scalar_prefetch=0,
            grid=(n_blocks,),
            in_specs=[
                pl.BlockSpec((row_block, E), lambda i: (i, 0)),   # query rows
                pl.BlockSpec((E, HLk), lambda i: (0, 0)),         # QK_all
                pl.BlockSpec((HLk, E), lambda i: (0, 0)),         # Vout_all
                pl.BlockSpec((HLk, HLk), lambda i: (0, 0)),       # segment ones
                pl.BlockSpec((1, E), lambda i: (0, 0)),           # bias
            ],
            out_specs=pl.BlockSpec((row_block, E), lambda i: (i, 0)),
        ),
        compiler_params=pltpu.CompilerParams(
            dimension_semantics=("parallel",)),
    )(q2d, qk_all, vout_all, seg, bias2d)

    return out2d[:rows].reshape(N, Lq, E)


def init_params(key):
    """Deterministic nn.Linear-style init (uniform +-1/sqrt(fan_in))."""
    ks = jax.random.split(key, 5)

    def lin(k, out_f, in_f):
        bound = 1.0 / np.sqrt(in_f)
        return jax.random.uniform(k, (out_f, in_f), jnp.float32, -bound, bound)

    Wq = lin(ks[0], EMBED_SIZE, QUERY_DIM)      # queries: (E, query_dim)
    Wk = lin(ks[1], EMBED_SIZE, KV_DIM)         # keys:    (E, kv_dim)
    Wv = lin(ks[2], EMBED_SIZE, KV_DIM)         # values:  (E, kv_dim)
    Wo = lin(ks[3], EMBED_SIZE, EMBED_SIZE)     # fc_out:  (E, E)
    bo = jax.random.uniform(ks[4], (EMBED_SIZE,), jnp.float32,
                            -1.0 / np.sqrt(EMBED_SIZE), 1.0 / np.sqrt(EMBED_SIZE))
    return Wq, Wk, Wv, Wo, bo


def precompute(Wq, Wk, Wv, Wo, keys, values):
    """Glue (plain JAX): builds the fused qk and Vout tensors (= precompute())."""
    Lk = keys.shape[1]
    # keys_proj: (1, Lk, E) -> (H, hd, Lk)
    keys_proj = jnp.einsum('blk,ek->ble', keys, Wk)            # (1, Lk, E)
    keys_proj = keys_proj.reshape(1, Lk, HEADS, HEAD_DIM)
    keys_proj = jnp.transpose(keys_proj, (0, 2, 3, 1))[0]      # (H, hd, Lk)
    # Wq: (E, query_dim=E) -> (H, hd, E) -> (H, E, hd)
    Wq_h = Wq.reshape(HEADS, HEAD_DIM, EMBED_SIZE)
    Wq_h = jnp.transpose(Wq_h, (0, 2, 1))                      # (H, E, hd)
    qk = jnp.einsum('hed,hdk->hek', Wq_h, keys_proj)           # (H, E, Lk)

    # values_proj: (1, Lk, E) -> (H, Lk, hd)
    values_proj = jnp.einsum('blk,ek->ble', values, Wv)        # (1, Lk, E)
    values_proj = values_proj.reshape(1, Lk, HEADS, HEAD_DIM)
    values_proj = jnp.transpose(values_proj, (0, 2, 1, 3))[0]  # (H, Lk, hd)
    # W_out = fc_out.weight.T : (E_in, E_out) -> (H, hd, E)
    Wo_h = Wo.T.reshape(HEADS, HEAD_DIM, EMBED_SIZE)           # (H, hd, E)
    vout = jnp.einsum('hkd,hde->hke', values_proj, Wo_h)       # (H, Lk, E)
    return qk, vout


def reference_forward(queries, qk, vout, bias):
    """Pure-JAX replica of fused_fwd for validation."""
    energy = jnp.einsum('nqe,hek->nhqk', queries, qk)          # (N, H, Lq, Lk)
    attn = jax.nn.softmax(energy / (HEAD_DIM ** 0.5), axis=3)
    out = jnp.einsum('nhqk,hke->nhqe', attn, vout)             # (N, H, Lq, E)
    out = jnp.sum(out, axis=1) + bias
    return out


if __name__ == "__main__":
    key = jax.random.PRNGKey(0)
    kp, kq, kk, kv = jax.random.split(key, 4)

    N, Lq, Lk = 2, 16, 8
    queries = jax.random.normal(kq, (N, Lq, QUERY_DIM), jnp.float32)
    keys = jax.random.normal(kk, (1, Lk, KV_DIM), jnp.float32)
    values = jax.random.normal(kv, (1, Lk, KV_DIM), jnp.float32)

    Wq, Wk, Wv, Wo, bo = init_params(kp)
    qk, vout = precompute(Wq, Wk, Wv, Wo, keys, values)
    ref = reference_forward(queries, qk, vout, bo)

    # f32 path: tight correctness check of the restructured kernel math.
    out_f32 = jax.block_until_ready(
        fused_cross_attention(queries, qk, vout, bo, compute_dtype=jnp.float32))
    np.testing.assert_allclose(np.asarray(out_f32), np.asarray(ref),
                               rtol=1e-4, atol=1e-4)

    # bf16 path (default; MXU-native on v6e/v7x, half the HBM traffic).
    out_bf16 = jax.block_until_ready(fused_cross_attention(queries, qk, vout, bo))
    np.testing.assert_allclose(np.asarray(out_bf16), np.asarray(ref),
                               rtol=2e-2, atol=2e-2)

    print("KERNEL_OK")
</pallas_src>

<mosaic_0001>
module attributes {stable_mosaic.version = 11 : i64} {
  func.func @_cross_attn_kernel(%arg0: i32, %arg1: memref<16x320xf32, #tpu.memory_space<vmem>>, %arg2: memref<320x64xf32, #tpu.memory_space<vmem>>, %arg3: memref<64x320xf32, #tpu.memory_space<vmem>>, %arg4: memref<64x64xf32, #tpu.memory_space<vmem>>, %arg5: memref<1x320xf32, #tpu.memory_space<vmem>>, %arg6: memref<16x320xf32, #tpu.memory_space<vmem>>) attributes {dimension_semantics = [#tpu.dimension_semantics<parallel>], iteration_bounds = array<i64: 2>, scalar_prefetch = 0 : i64, scratch_operands = 0 : i64, tpu.core_type = #tpu.core_type<tc>, window_params = [{transform_indices = @transform_0, window_bounds = array<i64: 16, 320>}, {pipeline_mode = #tpu.pipeline_mode<synchronous>, transform_indices = @transform_1, window_bounds = array<i64: 320, 64>}, {pipeline_mode = #tpu.pipeline_mode<synchronous>, transform_indices = @transform_2, window_bounds = array<i64: 64, 320>}, {pipeline_mode = #tpu.pipeline_mode<synchronous>, transform_indices = @transform_3, window_bounds = array<i64: 64, 64>}, {pipeline_mode = #tpu.pipeline_mode<synchronous>, transform_indices = @transform_4, window_bounds = array<i64: 1, 320>}, {transform_indices = @transform_5, window_bounds = array<i64: 16, 320>}]} {
    %c0 = arith.constant 0 : index
    %c0_0 = arith.constant 0 : index
    %0 = vector.load %arg1[%c0, %c0_0] : memref<16x320xf32, #tpu.memory_space<vmem>>, vector<16x320xf32>
    %c0_1 = arith.constant 0 : index
    %c0_2 = arith.constant 0 : index
    %1 = vector.load %arg2[%c0_1, %c0_2] : memref<320x64xf32, #tpu.memory_space<vmem>>, vector<320x64xf32>
    %c0_3 = arith.constant 0 : index
    %c0_4 = arith.constant 0 : index
    %2 = vector.load %arg3[%c0_3, %c0_4] : memref<64x320xf32, #tpu.memory_space<vmem>>, vector<64x320xf32>
    %c0_5 = arith.constant 0 : index
    %c0_6 = arith.constant 0 : index
    %3 = vector.load %arg4[%c0_5, %c0_6] : memref<64x64xf32, #tpu.memory_space<vmem>>, vector<64x64xf32>
    %cst = arith.constant dense<0.000000e+00> : vector<16x64xf32>
    %4 = tpu.matmul %0, %1, %cst {dimension_numbers = #tpu.dot_dimension_numbers<[1], [0], [0], [1], [0, 0, 1, 1], [], []>} : vector<16x320xf32>, vector<320x64xf32>, vector<16x64xf32> -> vector<16x64xf32>
    %cst_7 = arith.constant 0.158113882 : f32
    %5 = vector.broadcast %cst_7 : f32 to vector<16x64xf32>
    %6 = arith.mulf %4, %5 : vector<16x64xf32>
    %cst_8 = arith.constant dense<0xFF800000> : vector<16xf32>
    %7 = vector.multi_reduction <maximumf>, %6, %cst_8 [1] : vector<16x64xf32> to vector<16xf32>
    %8 = vector.shape_cast %7 : vector<16xf32> to vector<16x1xf32>
    %9 = vector.broadcast %8 : vector<16x1xf32> to vector<16x64xf32>
    %10 = arith.subf %6, %9 : vector<16x64xf32>
    %11 = math.exp %10 : vector<16x64xf32>
    %cst_9 = arith.constant dense<0.000000e+00> : vector<16x64xf32>
    %12 = tpu.matmul %11, %3, %cst_9 {dimension_numbers = #tpu.dot_dimension_numbers<[1], [0], [0], [1], [0, 0, 1, 1], [], []>} : vector<16x64xf32>, vector<64x64xf32>, vector<16x64xf32> -> vector<16x64xf32>
    %13 = arith.divf %11, %12 : vector<16x64xf32>
    %cst_10 = arith.constant dense<0.000000e+00> : vector<16x320xf32>
    %14 = tpu.matmul %13, %2, %cst_10 {dimension_numbers = #tpu.dot_dimension_numbers<[1], [0], [0], [1], [0, 0, 1, 1], [], []>} : vector<16x64xf32>, vector<64x320xf32>, vector<16x320xf32> -> vector<16x320xf32>
    %c0_11 = arith.constant 0 : index
    %c0_12 = arith.constant 0 : index
    %15 = vector.load %arg5[%c0_11, %c0_12] : memref<1x320xf32, #tpu.memory_space<vmem>>, vector<1x320xf32>
    %16 = vector.broadcast %15 : vector<1x320xf32> to vector<16x320xf32>
    %17 = arith.addf %14, %16 : vector<16x320xf32>
    %c0_13 = arith.constant 0 : index
    %c0_14 = arith.constant 0 : index
    %18 = vector.load %arg6[%c0_13, %c0_14] : memref<16x320xf32, #tpu.memory_space<vmem>>, vector<16x320xf32>
    tpu.vector_store %arg6[%c0_13, %c0_14], %17 {strides = array<i32>} : memref<16x320xf32, #tpu.memory_space<vmem>>, vector<16x320xf32>,
    return
  }
  func.func @transform_0(%arg0: i32) -> (i32, i32) {
    %c0_i32 = arith.constant 0 : i32
    %c0_i32_0 = arith.constant 0 : i32
    return %arg0, %c0_i32 : i32, i32
  }
  func.func @transform_1(%arg0: i32) -> (i32, i32) {
    %c0_i32 = arith.constant 0 : i32
    %c0_i32_0 = arith.constant 0 : i32
    %c0_i32_1 = arith.constant 0 : i32
    return %c0_i32, %c0_i32_0 : i32, i32
  }
  func.func @transform_2(%arg0: i32) -> (i32, i32) {
    %c0_i32 = arith.constant 0 : i32
    %c0_i32_0 = arith.constant 0 : i32
    %c0_i32_1 = arith.constant 0 : i32
    return %c0_i32, %c0_i32_0 : i32, i32
  }
  func.func @transform_3(%arg0: i32) -> (i32, i32) {
    %c0_i32 = arith.constant 0 : i32
    %c0_i32_0 = arith.constant 0 : i32
    %c0_i32_1 = arith.constant 0 : i32
    return %c0_i32, %c0_i32_0 : i32, i32
  }
  func.func @transform_4(%arg0: i32) -> (i32, i32) {
    %c0_i32 = arith.constant 0 : i32
    %c0_i32_0 = arith.constant 0 : i32
    %c0_i32_1 = arith.constant 0 : i32
    return %c0_i32, %c0_i32_0 : i32, i32
  }
  func.func @transform_5(%arg0: i32) -> (i32, i32) {
    %c0_i32 = arith.constant 0 : i32
    %c0_i32_0 = arith.constant 0 : i32
    return %arg0, %c0_i32 : i32, i32
  }
}

</mosaic_0001>

<bundles_post_ra>
// kernel: tpu_custom_call.1
= control target key start
LH: loop header
LB: loop body
LE: loop exit
PB: predicated region body
PF: predicated region fallthrough
CT: control target
= control target key end

     0   :  { %10 = vsyncpa [#allocation3], 0  ;;  %s1138_s0 = inlined_call_operand.vmem [shape: f32[32,320], index: 0, kind: input, shape index: {}]   ;;  %s1139_s1 = inlined_call_operand.vmem [shape: f32[320,64], index: 1, kind: input, shape index: {}]   ;;  %s1140_s2 = inlined_call_operand.vmem [shape: f32[64,320], index: 2, kind: input, shape index: {}]   ;;  %s1141_s3 = inlined_call_operand.vmem [shape: f32[64,64], index: 3, kind: input, shape index: {}]   ;;  %s1142_s4 = inlined_call_operand.vmem [shape: f32[1,320], index: 4, kind: input, shape index: {}]   ;;  %s1143_s5 = inlined_call_operand.hbm [shape: f32[32,320], index: 5, kind: output, shape index: {}]  }
   0x1   :  { %12 = vsyncpa [#allocation3 + $0x1], 0  ;;  %s801_s18 = smov 0   ;;  %s803_s19 = smov 0  }
   0x2   :  { %s805_s20 = smov 0   ;;  %s807_s21 = smov 0  }
   0x3 LB: > { %s822_s22 = sadd.s32 4294967295, %s767_s21   ;;  %s624_s23 = sadd.s32 4294967294, %s767_s21   ;;  %s767_s21 = sphi %s807_s21, %s1149_s21   ;;  %s763_s20 = sphi %s805_s20, %s1148_s20   ;;  %s759_s19 = sphi %s803_s19, %s1147_s19   ;;  %s755_s18 = sphi %s801_s18, %s1146_s18  }
   0x4   : > { %s826_s24 = sadd.s32 1, %s767_s21   ;;  %s135_s25 = sadd.s32 1, %s763_s20 }
   0x5   : > { %s132_s26 = ssub.s32 %s767_s21, %s826_s24  ;;  %p145_p0 = scmp.ne.s32.totalorder %s763_s20, %s759_s19 }
   0x6   : > { %p133_p1 = scmp.eq.s32.totalorder %s132_s26, 0  ;;  %p146_p2 = scmp.eq.s32.totalorder %s822_s22, 1 }
   0x7   : > { %p151_p3 = scmp.ne.s32.totalorder %s759_s19, %s755_s18  ;;  %p152_p4 = scmp.eq.s32.totalorder %s624_s23, 1 }
   0x8   : > { %s837_s27 = scalar_select %p133_p1, %s763_s20, %s135_s25  }
   0x9   : > { %p839_p5 = por %p146_p2, %p145_p0  ;;  %p843_p6 = por %p152_p4, %p151_p3 }
   0xa   : > { %p627_p7 = scmp.ge.s32.totalorder %s767_s21, 1  ;;  %p192_p8 = scmp.lt.s32.totalorder %s767_s21, 3 }
   0xc   : > { %p193_p9 = pnand %p627_p7, %p192_p8 }
   0xd   : > { %s628_s13 = sshll.u32 (!%p193_p9), %s822_s22, 1  ;;  %s218_s12 = sand.u32 (!%p193_p9), 1, %s759_s19  }
   0xe   : > { %196 = sbr.rel (%p193_p9) target bundleno = 610 (0x262), region = 40  ;;  %p222_p10 = scmp.lt.s32.totalorder (!%p193_p9), %s628_s13, 3 }
   0xf   : > { %s653_s16 = smul.u32 (!%p193_p9), 48, %s218_s12  ;;  %s725_s11 = scalar_lea.hbm (!%p193_p9), %s1143_s5, 96 }
  0x10   : > { %s655_s25 = smul.u32 (!%p193_p9), 48, %s822_s22  ;;  %s546_s22 = scalar_lea.sflag (!%p193_p9), [#allocation3], %s218_s12 }
  0x12   : > { %s558_s6 = scalar_lea.hbm (!%p193_p9), %s1143_s5, %s655_s25 }
  0x13   : > { %v250_v0 = vld [vmem:[%s1139_s1 + $0x78] sm:$0xff]  ;;  %v249_v2 = vld [vmem:[%s1139_s1 + $0x70] sm:$0xff]  ;;  %v248_v4 = vld [vmem:[%s1139_s1 + $0x68] sm:$0xff]  ;;  %s1151_s13 = smov (!%p222_p10, %s628_s13), 3  ;;  %vm307_vm0 = vcmask 523264   ;;  %s561_s8 = sshll.u32 %s558_s6, 4  ;;  %s562_s8 = int_to_ptr.hbm [resolvable:$true] %s561_s8 }
  0x14   : > { %v266_v1 = vld [vmem:[%s1139_s1 + $0xf8] sm:$0xff]  ;;  %314 = vmatpush.msra.mxu0 %v250_v0  ;;  %v265_v3 = vld [vmem:[%s1139_s1 + $0xf0] sm:$0xff]  ;;  %v264_v5 = vld [vmem:[%s1139_s1 + $0xe8] sm:$0xff]  ;;  %s654_s23 = smul.u32 24, %s1151_s13 }
  0x15   : > { %337 = vmatpush.msra.mxu1 %v266_v1  ;;  %v247_v6 = vld [vmem:[%s1139_s1 + $0x60] sm:$0xff]  ;;  %v274_v8 = vld [vmem:[%s1139_s1 + $0x138] sm:$0xff]  ;;  %v273_v9 = vld [vmem:[%s1139_s1 + $0x130] sm:$0xff] }
  0x16   : > { %315 = vmatpush.msra.mxu0 %v249_v2  ;;  %v263_v7 = vld [vmem:[%s1139_s1 + $0xe0] sm:$0xff]  ;;  %v246_v10 = vld [vmem:[%s1139_s1 + $0x58] sm:$0xff]  ;;  %368 = vmatpush.msra.mxu2 %v274_v8  ;;  %v272_v12 = vld [vmem:[%s1139_s1 + $0x128] sm:$0xff]  ;;  %s934_s17 = scalar_lea.vmem %s1138_s0, %s654_s23  ;;  %s719_s23 = sshra.s32 %s562_s8, 4  ;;  %s720_s23 = int_to_ptr.hbm [resolvable:$true] %s719_s23 }
  0x17   : > { %338 = vmatpush.msra.mxu1 %v265_v3  ;;  %v262_v11 = vld [vmem:[%s1139_s1 + $0xd8] sm:$0xff]  ;;  %v245_v13 = vld [vmem:[%s1139_s1 + $0x50] sm:$0xff]  ;;  %v271_v15 = vld [vmem:[%s1139_s1 + $0x120] sm:$0xff]  ;;  %s721_s9 = scalar_lea.hbm %s720_s23, 48  ;;  %p726_p0 = scmp.lt.s32.totalorder %s720_s23, %s1143_s5 }
  0x18   : > { %316 = vmatpush.msra.mxu0 %v248_v4  ;;  %v261_v14 = vld [vmem:[%s1139_s1 + $0xd0] sm:$0xff]  ;;  %369 = vmatpush.msra.mxu2 %v273_v9  ;;  %v244_v16 = vld [vmem:[%s1139_s1 + $0x48] sm:$0xff]  ;;  %v270_v18 = vld [vmem:[%s1139_s1 + $0x118] sm:$0xff]  ;;  %p722_p11 = scmp.ne.s32.totalorder %s720_s23, %s721_s9  ;;  %p727_p1 = scmp.lt.s32.totalorder %s725_s11, %s721_s9 }
  0x19   : > { %339 = vmatpush.msra.mxu1 %v264_v5  ;;  %v260_v17 = vld [vmem:[%s1139_s1 + $0xc8] sm:$0xff]  ;;  %v243_v19 = vld [vmem:[%s1139_s1 + $0x40] sm:$0xff]  ;;  %v269_v21 = vld [vmem:[%s1139_s1 + $0x110] sm:$0xff] }
  0x1a   : > { %317 = vmatpush.msra.mxu0 %v247_v6  ;;  %370 = vmatpush.msra.mxu2 %v272_v12  ;;  %v259_v20 = vld [vmem:[%s1139_s1 + $0xc0] sm:$0xff]  ;;  %v242_v22 = vld [vmem:[%s1139_s1 + $0x38] sm:$0xff]  ;;  %v268_v24 = vld [vmem:[%s1139_s1 + $0x108] sm:$0xff]  ;;  %p723_p12 = pnand %p722_p11, %p839_p5  ;;  %p728_p2 = por %p727_p1, %p726_p0 }
  0x1b   : > { %340 = vmatpush.msra.mxu1 %v263_v7  ;;  %v258_v23 = vld [vmem:[%s1139_s1 + $0xb8] sm:$0xff]  ;;  %v241_v25 = vld [vmem:[%s1139_s1 + $0x30] sm:$0xff]  ;;  %v267_v27 = vld [vmem:[%s1139_s1 + $0x100] sm:$0xff] }
  0x1c   : > { %318 = vmatpush.msra.mxu0 %v246_v10  ;;  %371 = vmatpush.msra.mxu2 %v271_v15  ;;  %v257_v26 = vld [vmem:[%s1139_s1 + $0xb0] sm:$0xff]  ;;  %v240_v28 = vld [vmem:[%s1139_s1 + $0x28] sm:$0xff]  ;;  %v239_v31 = vld [vmem:[%s1139_s1 + $0x20] sm:$0xff]  ;;  %p724_p13 = pneg %p723_p12 }
  0x1d   : > { %341 = vmatpush.msra.mxu1 %v262_v11  ;;  %v256_v29 = vld [vmem:[%s1139_s1 + $0xa8] sm:$0xff]  ;;  %v231_v30 = vld [vmem:[%s934_s17 + $0x10] sm:$0xff]  ;;  %v255_v32 = vld [vmem:[%s1139_s1 + $0xa0] sm:$0xff] }
  0x1e   : > { %319 = vmatpush.msra.mxu0 %v245_v13  ;;  %372 = vmatpush.msra.mxu2 %v270_v18  ;;  %v238_v33 = vld [vmem:[%s1139_s1 + $0x18] sm:$0xff]  ;;  %v237_v35 = vld [vmem:[%s1139_s1 + $0x10] sm:$0xff]  ;;  %v236_v37 = vld [vmem:[%s1139_s1 + $0x8] sm:$0xff]  ;;  %p729_p3 = pnand %p728_p2, %p724_p13 }
  0x1f   : > { %342 = vmatpush.msra.mxu1 %v261_v14  ;;  %v254_v34 = vld [vmem:[%s1139_s1 + $0x98] sm:$0xff]  ;;  %v253_v36 = vld [vmem:[%s1139_s1 + $0x90] sm:$0xff]  ;;  %v252_v38 = vld [vmem:[%s1139_s1 + $0x88] sm:$0xff] }
  0x20   : > { %320 = vmatpush.msra.mxu0 %v244_v16  ;;  %373 = vmatpush.msra.mxu2 %v269_v21  ;;  %v234_v39 = vld [vmem:[%s934_s17 + $0x28] sm:$0xff]  ;;  %v235_v40 = vld [vmem:[%s1139_s1] sm:$0xff]  ;;  %v232_v44 = vld [vmem:[%s934_s17 + $0x18] sm:$0xff] }
  0x21   : > { %343 = vmatpush.msra.mxu1 %v260_v17  ;;  %v251_v41 = vld [vmem:[%s1139_s1 + $0x80] sm:$0xff]  ;;  %v230_v43 = vld [vmem:[%s934_s17 + $0x8] sm:$0xff]  ;;  %v306_v46 = vld [vmem:[%s1141_s3 + $0x38] sm:$0xff] }
  0x22   : > { %321 = vmatpush.msra.mxu0 %v243_v19  ;;  %374 = vmatpush.msra.mxu2 %v268_v24  ;;  %v229_v42 = vld [vmem:[%s934_s17] sm:$0xff]  ;;  %v305_v47 = vld [vmem:[%s1141_s3 + $0x30] sm:$0xff]  ;;  %v304_v62 = vld [vmem:[%s1141_s3 + $0x28] sm:$0xff] }
  0x23   : > { %344 = vmatpush.msra.mxu1 %v259_v20  ;;  %v233_v45 = vld [vmem:[%s934_s17 + $0x20] sm:$0xff]  ;;  %411 = vmatpush.msra.mxu3 %v306_v46  ;;  %v302_v0 = vld [vmem:[%s1141_s3 + $0x18] sm:$0xff]  ;;  %v301_v1 = vld [vmem:[%s1141_s3 + $0x10] sm:$0xff]  ;;  %s220_s17 = scalar_lea.vmem [#allocation2], %s653_s16 }
  0x24   : > { %322 = vmatpush.msra.mxu0 %v242_v22  ;;  %375 = vmatpush.msra.mxu2 %v267_v27  ;;  %v303_v63 = vld [vmem:[%s1141_s3 + $0x20] sm:$0xff]  ;;  %v300_v2 = vld [vmem:[%s1141_s3 + $0x8] sm:$0xff]  ;;  %v297_v13 = vld [vmem:[%s1140_s2 + $0xb0] sm:$0xff]  ;;  %s559_s7 = sshll.u32 %s220_s17, 4  ;;  %s560_s7 = int_to_ptr.vmem [resolvable:$true] %s559_s7 }
  0x25   : > { %345 = vmatpush.msra.mxu1 %v258_v23  ;;  %630 = vmatmul.msk.f32.vlgmr.msra.gmra.mxu2 %vm307_vm0, %v231_v30  ;;  %v299_v3 = vld [vmem:[%s1141_s3] sm:$0xff]  ;;  %v296_v12 = vld [vmem:[%s1140_s2 + $0xa8] sm:$0xff]  ;;  %v298_v14 = vld [vmem:[%s1140_s2 + $0xb8] sm:$0xff] }
  0x26   : > { %323 = vmatpush.msra.mxu0 %v241_v25  ;;  %412 = vmatpush.msra.mxu3 %v305_v47  ;;  %v293_v15 = vld [vmem:[%s1140_s2 + $0x90] sm:$0xff]  ;;  %v294_v16 = vld [vmem:[%s1140_s2 + $0x98] sm:$0xff]  ;;  %v295_v17 = vld [vmem:[%s1140_s2 + $0xa0] sm:$0xff] }
  0x27   : > { %346 = vmatpush.msra.mxu1 %v257_v26  ;;  %478 = vmatpush.msrb.mxu2 %v296_v12  ;;  %v290_v18 = vld [vmem:[%s1140_s2 + $0x78] sm:$0xff]  ;;  %v291_v19 = vld [vmem:[%s1140_s2 + $0x80] sm:$0xff]  ;;  %v292_v20 = vld [vmem:[%s1140_s2 + $0x88] sm:$0xff] }
  0x28   : > { %324 = vmatpush.msra.mxu0 %v240_v28  ;;  %413 = vmatpush.msra.mxu3 %v304_v62  ;;  %v287_v21 = vld [vmem:[%s1140_s2 + $0x60] sm:$0xff]  ;;  %v288_v22 = vld [vmem:[%s1140_s2 + $0x68] sm:$0xff]  ;;  %v289_v23 = vld [vmem:[%s1140_s2 + $0x70] sm:$0xff] }
  0x29   : > { %347 = vmatpush.msra.mxu1 %v256_v29  ;;  %479 = vmatpush.msrb.mxu2 %v293_v15  ;;  %v284_v24 = vld [vmem:[%s1140_s2 + $0x48] sm:$0xff]  ;;  %v285_v25 = vld [vmem:[%s1140_s2 + $0x50] sm:$0xff]  ;;  %v286_v26 = vld [vmem:[%s1140_s2 + $0x58] sm:$0xff] }
  0x2a   : > { %325 = vmatpush.msra.mxu0 %v239_v31  ;;  %414 = vmatpush.msra.mxu3 %v303_v63  ;;  %v281_v27 = vld [vmem:[%s1140_s2 + $0x30] sm:$0xff]  ;;  %v282_v28 = vld [vmem:[%s1140_s2 + $0x38] sm:$0xff]  ;;  %v283_v29 = vld [vmem:[%s1140_s2 + $0x40] sm:$0xff] }
  0x2b   : > { %348 = vmatpush.msra.mxu1 %v255_v32  ;;  %480 = vmatpush.msrb.mxu2 %v290_v18  ;;  %v278_v30 = vld [vmem:[%s1140_s2 + $0x18] sm:$0xff]  ;;  %v279_v31 = vld [vmem:[%s1140_s2 + $0x20] sm:$0xff]  ;;  %v280_v32 = vld [vmem:[%s1140_s2 + $0x28] sm:$0xff] }
  0x2c   : > { %326 = vmatpush.msra.mxu0 %v238_v33  ;;  %415 = vmatpush.msra.mxu3 %v302_v0  ;;  %v275_v33 = vld [vmem:[%s1140_s2] sm:$0xff] }
  0x2d   : > { %349 = vmatpush.msra.mxu1 %v254_v34  ;;  %631 = vmatmul.msk.f32.gmra.mxu2 %vm307_vm0, %v234_v39  ;;  %v276_v34 = vld [vmem:[%s1140_s2 + $0x8] sm:$0xff] }
  0x2e   : > { %327 = vmatpush.msra.mxu0 %v237_v35  ;;  %416 = vmatpush.msra.mxu3 %v301_v1  ;;  %v277_v35 = vld [vmem:[%s1140_s2 + $0x10] sm:$0xff] }
  0x2f   : > { %350 = vmatpush.msra.mxu1 %v253_v36  ;;  %481 = vmatpush.msrb.mxu2 %v287_v21 }
  0x30   : > { %328 = vmatpush.msra.mxu0 %v236_v37  ;;  %417 = vmatpush.msra.mxu3 %v300_v2 }
  0x31   : > { %351 = vmatpush.msra.mxu1 %v252_v38  ;;  %482 = vmatpush.msrb.mxu2 %v284_v24 }
  0x32   : > { %329 = vmatpush.msra.mxu0 %v235_v40  ;;  %418 = vmatpush.msra.mxu3 %v299_v3 }
  0x33   : > { %352 = vmatpush.msra.mxu1 %v251_v41  ;;  %330 = vmatmul.f32.vlgmr.msra.gmra.mxu0 %v229_v42 }
  0x34   : > { %353 = vmatmul.f32.vlgmr.msra.gmra.mxu1 %v230_v43  ;;  %501 = vmatpush.msrb.mxu3 %v297_v13 }
  0x35   : > { %524 = vmatpush.msrb.mxu0 %v298_v14  ;;  %645 = vmatpush.msrb.mxu1 %v298_v14 }
  0x36   : > { %502 = vmatpush.msrb.mxu3 %v294_v16  ;;  %483 = vmatpush.msrb.mxu2 %v281_v27 }
  0x37   : > { %525 = vmatpush.msrb.mxu0 %v295_v17  ;;  %646 = vmatpush.msrb.mxu1 %v295_v17 }
  0x38   : > { %503 = vmatpush.msrb.mxu3 %v291_v19  ;;  %484 = vmatpush.msrb.mxu2 %v278_v30 }
  0x39   : > { %526 = vmatpush.msrb.mxu0 %v292_v20  ;;  %647 = vmatpush.msrb.mxu1 %v292_v20 }
  0x3a   : > { %504 = vmatpush.msrb.mxu3 %v288_v22  ;;  %485 = vmatpush.msrb.mxu2 %v275_v33 }
  0x3b   : > { %333 = vmatmul.f32.gmra.mxu0 %v232_v44  ;;  %648 = vmatpush.msrb.mxu1 %v289_v23 }
  0x3c   : > { %356 = vmatmul.f32.gmra.mxu1 %v233_v45  ;;  %527 = vmatpush.msrb.mxu0 %v289_v23 }
  0x3d   : > { %505 = vmatpush.msrb.mxu3 %v285_v25  ;;  %649 = vmatpush.msrb.mxu1 %v286_v26 }
  0x3e   : > { %528 = vmatpush.msrb.mxu0 %v286_v26 }
  0x3f   : > { %506 = vmatpush.msrb.mxu3 %v282_v28  ;;  %650 = vmatpush.msrb.mxu1 %v283_v29 }
  0x40   : > { %529 = vmatpush.msrb.mxu0 %v283_v29 }
  0x41   : > { %507 = vmatpush.msrb.mxu3 %v279_v31  ;;  %651 = vmatpush.msrb.mxu1 %v280_v32 }
  0x42   : > { %530 = vmatpush.msrb.mxu0 %v280_v32 }
  0x43   : > { %508 = vmatpush.msrb.mxu3 %v276_v34  ;;  %652 = vmatpush.msrb.mxu1 %v277_v35 }
  0x44   : > { %531 = vmatpush.msrb.mxu0 %v277_v35 }
  0xa8   : > { %v377_v48 = vpop.f32.mrf.mxu2 }
  0xb0   : > { %v331_v49 = vpop.f32.mrf.mxu0  ;;  %v380_v55 = vpop.f32.mrf.mxu2 }
  0xb1   : > { %v354_v50 = vpop.f32.mrf.mxu1 }
  0xb2   : > { %v355_v51 = vadd.f32 %v354_v50, %v331_v49 }
  0xb4   : > { %v378_v52 = vadd.f32 %v377_v48, %v355_v51 }
  0xb6   : > { %v383_v53 = vmul.f32 0.15811388, %v378_v52 }
  0xb8   : > { %v385_v54 = vsel %vm307_vm0, %v383_v53, -inf  ;;  %v334_v57 = vpop.f32.mrf.mxu0 }
  0xb9   : > { %v357_v56 = vpop.f32.mrf.mxu1  ;;  %386 = vmax.xlane.f32.xlu0 %v385_v54 }
  0xba   : > { %v358_v58 = vadd.f32 %v357_v56, %v334_v57 }
  0xbc   : > { %v381_v59 = vadd.f32 %v380_v55, %v358_v58 }
  0xbe   : > { %v384_v60 = vmul.f32 0.15811388, %v381_v59 }
  0xc0   : > { %v388_v61 = vsel %vm307_vm0, %v384_v60, -inf }
  0xc1   : > { %389 = vmax.xlane.f32.xlu0 %v388_v61 }
 0x12c   : > { %v387_v4 = vpop.xlane.xlu0 %386 }
 0x12d   : > { %v391_v5 = vsub.f32 %v383_v53, %v387_v4 }
 0x12f   : > { %v393_v6 = vmul.f32 1.442695, %v391_v5 }
 0x131   : > { %697 = vpow2.f32 %v393_v6 }
 0x134   : > { %v390_v7 = vpop.xlane.xlu0 %389 }
 0x135   : > { %v392_v8 = vsub.f32 %v384_v60, %v390_v7  ;;  %v456_v60 = vld [vmem:[%s1142_s4] sm:$0x7] }
 0x136   : > { %v460_v61 = vperm.slane %v456_v60, 2  ;;  %v458_v0 = vperm.slane %v456_v60, 0  ;;  %v459_v1 = vperm.slane %v456_v60, 1 }
 0x137   : > { %v1009_v9 = vpop.eup %697  ;;  %v395_v10 = vmul.f32 1.442695, %v392_v8 }
 0x138   : > { %632 = vmatmul.msk.f32.vlgmr.msra.gmra.mxu3 %vm307_vm0, %v1009_v9 }
 0x139   : > { %699 = vpow2.f32 %v395_v10 }
 0x13f   : > { %v1013_v11 = vpop.eup %699 }
 0x140   : > { %633 = vmatmul.msk.f32.gmra.mxu3 %vm307_vm0, %v1013_v11 }
 0x1bb   : > { %v420_v36 = vpop.f32.mrf.mxu3 }
 0x1bc   : > { %701 = vrcp.f32 %v420_v36  ;;  %v437_v41 = vand.u32 2147483648, %v420_v36  ;;  %v435_v43 = vand.u32 2147483647, %v420_v36  ;;  %vm431_vm2 = vweird.f32 %v420_v36 }
 0x1be   : > { %v438_v46 = vor.u32 1.1754944e-38, %v437_v41  ;;  %vm436_vm4 = vcmp.eq.f32.partialorder %v435_v43, 8.507059e+37 }
 0x1c2   : > { %v702_v37 = vpop.eup %701 }
 0x1c3   : > { %v427_v38 = vmul.f32 %v702_v37, %v420_v36  ;;  %v423_v39 = vpop.f32.mrf.mxu3  ;;  %vm432_vm1 = vweird.f32 %v702_v37 }
 0x1c4   : > { %703 = vrcp.f32 %v423_v39  ;;  %vm433_vm3 = vmor %vm431_vm2, %vm432_vm1  ;;  %v452_v52 = vand.u32 2147483648, %v423_v39  ;;  %v450_v54 = vand.u32 2147483647, %v423_v39  ;;  %vm446_vm6 = vweird.f32 %v423_v39 }
 0x1c5   : > { %v428_v40 = vsub.f32 1.0, %v427_v38 }
 0x1c6   : > { %v453_v56 = vor.u32 1.1754944e-38, %v452_v52  ;;  %vm451_vm8 = vcmp.eq.f32.partialorder %v450_v54, 8.507059e+37 }
 0x1c7   : > { %v429_v42 = vmul.f32 %v702_v37, %v428_v40 }
 0x1c9   : > { %v430_v44 = vadd.f32 %v702_v37, %v429_v42 }
 0x1ca   : > { %v704_v45 = vpop.eup %703 }
 0x1cb   : > { %v442_v47 = vmul.f32 %v704_v45, %v423_v39  ;;  %v434_v48 = vsel %vm433_vm3, %v702_v37, %v430_v44  ;;  %vm447_vm5 = vweird.f32 %v704_v45 }
 0x1cc   : > { %v439_v49 = vsel %vm436_vm4, %v438_v46, %v434_v48  ;;  %vm448_vm7 = vmor %vm446_vm6, %vm447_vm5 }
 0x1cd   : > { %v443_v50 = vsub.f32 1.0, %v442_v47  ;;  %v440_v51 = vmul.f32 %v1009_v9, %v439_v49 }
 0x1cf   : > { %v444_v53 = vmul.f32 %v704_v45, %v443_v50  ;;  %634 = vmatmul.msk.f32.vlgmr.msrb.gmra.mxu2 %vm307_vm0, %v440_v51  ;;  %636 = vmatmul.msk.f32.vlgmr.msrb.gmra.mxu3 %vm307_vm0, %v440_v51 }
 0x1d0   : > { %638 = vmatmul.msk.f32.vlgmr.msrb.gmra.mxu0 %vm307_vm0, %v440_v51 }
 0x1d1   : > { %v445_v55 = vadd.f32 %v704_v45, %v444_v53 }
 0x1d3   : > { %v449_v57 = vsel %vm448_vm7, %v704_v45, %v445_v55 }
 0x1d4   : > { %v454_v58 = vsel %vm451_vm8, %v453_v56, %v449_v57 }
 0x1d5   : > { %v455_v59 = vmul.f32 %v1013_v11, %v454_v58 }
 0x1d7   : > { %635 = vmatmul.msk.f32.gmra.mxu2 %vm307_vm0, %v455_v59  ;;  %637 = vmatmul.msk.f32.gmra.mxu3 %vm307_vm0, %v455_v59 }
 0x1d8   : > { %639 = vmatmul.msk.f32.vlgmr.msrb.gmra.mxu1 %vm307_vm0, %v455_v59 }
 0x24d   : > { %v533_v62 = vpop.f32.mrf.mxu0 }
 0x24e   : > { %v534_v63 = vadd.f32 %v533_v62, %v460_v61 }
 0x250   : > { %541 = vst.msk [vmem:[%s220_s17 + $0x10] sm:$0xff] %vm307_vm0, %v534_v63 }
 0x252   : > { %v487_v2 = vpop.f32.mrf.mxu2  ;;  %v510_v3 = vpop.f32.mrf.mxu3 }
 0x253   : > { %v488_v4 = vadd.f32 %v487_v2, %v458_v0  ;;  %v511_v5 = vadd.f32 %v510_v3, %v459_v1 }
 0x255   : > { %539 = vst [vmem:[%s220_s17] sm:$0xff] %v488_v4  ;;  %v536_v6 = vpop.f32.mrf.mxu1 }
 0x256   : > { %540 = vst [vmem:[%s220_s17 + $0x8] sm:$0xff] %v511_v5  ;;  %v537_v7 = vadd.f32 %v536_v6, %v460_v61 }
 0x258   : > { %544 = vst.msk [vmem:[%s220_s17 + $0x28] sm:$0xff] %vm307_vm0, %v537_v7 }
 0x25a   : > { %v490_v8 = vpop.f32.mrf.mxu2  ;;  %v513_v9 = vpop.f32.mrf.mxu3 }
 0x25b   : > { %v491_v10 = vadd.f32 %v490_v8, %v458_v0  ;;  %v514_v11 = vadd.f32 %v513_v9, %v459_v1 }
 0x25d   : > { %542 = vst [vmem:[%s220_s17 + $0x18] sm:$0xff] %v491_v10 }
 0x25e   : > { %543 = vst [vmem:[%s220_s17 + $0x20] sm:$0xff] %v514_v11 }
 0x25f   : > { %732 = shalt.err (!%p729_p3)
}
 0x260   : > { %s769_s12 = smov 384   ;;  %s770_s16 = smov 24  }
 0x261   : > { %656 = dma.vmem_to_hbm [thread:$0]  (%p839_p5), %s560_s7, 768, %s562_s8, %s546_s22, %s769_s12, %s769_s12, %s770_s16  }
 0x262 PF: > { %p662_p4 = scmp.ge.s32.totalorder %s767_s21, 2  ;;  %s576_s17 = sand.u32 1, %s755_s18  }
 0x263   : > { %s577_s25 = scalar_lea.sflag [#allocation3], %s576_s17 }
 0x264   : > { %p659_p7 = pnand %p662_p4, %p843_p6 }
 0x266   : > { %p660_p8 = pneg %p659_p7 }
 0x268   : > { %750 = dma.done.wait (%p660_p8), %s577_s25, 768  }
 0x269   : > { %752 = vsyncadd (%p660_p8), %s577_s25, 4294966528  ;;  %p15_p9 = scmp.ge.s32.totalorder %s826_s24, 4   ;;  %s1146_s18 = smov %s759_s19 }
 0x26a   : > { %s1147_s19 = smov %s763_s20  ;;  %s1148_s20 = smov %s837_s27 }
 0x26b   : > { %s1149_s21 = smov %s826_s24  ;;  %17 = sbr.rel (!%p15_p9) target bundleno = 3 (0x3), region = 75 }
 0x270   :  { %583 = vsyncpa [#allocation3], 1 }
 0x271   :  { %585 = vsyncpa [#allocation3 + $0x1], 1 }

</bundles_post_ra>
